<compile_context>
chip_gen: v5e
topology: v5e:2x2
jax: 0.10.0
libtpu: 0.0.40
codegen_flags: <defaults>
</compile_context>

<pallas_src>
import functools

import jax
import jax.numpy as jnp
import numpy as np
from jax import lax
from jax.experimental import pallas as pl
from jax.experimental.pallas import tpu as pltpu

_NEG_BIG = -1e30   # finite "-inf" used for masking (exp underflows to 0 in f32;
                   # stacked masks can reach -2e30, still finite in f32).
_EPS_SQ = 1e-24    # norm floor 1e-12 (torch F.normalize eps); CosineSimilarity
                   # uses 1e-8 — only differs for near-zero rows.


def _round_up(x, m):
    return (x + m - 1) // m * m


def _tpu_vmem_capacity():
    try:
        cap = getattr(pltpu.get_tpu_info(), "vmem_capacity_bytes", None)
        if cap:
            return int(cap)
    except Exception:
        pass
    return 64 << 20   # conservative fallback (v7x-sized)


def _pick_tile_and_limit(B, Dp, block_rows):
    """Generation-aware row/col tile and explicit scoped-VMEM limit."""
    cap = _tpu_vmem_capacity()
    if cap >= (100 << 20):          # v5e / v6e: 128 MiB VMEM
        max_tile, vmem_limit = 512, 96 << 20
    else:                           # v7x: 64 MiB VMEM per TensorCore
        max_tile, vmem_limit = 256, 48 << 20
    if block_rows is not None:
        return max(8, _round_up(int(block_rows), 8)), vmem_limit
    # At least two row tiles whenever the batch allows it -> both v7x
    # TensorCores get work on the "parallel" row axis.
    tile = min(max_tile, max(8, _round_up((B + 1) // 2, 8)))
    # Footprint cap: double-buffered bf16 input windows (~16*T*Dp bytes) plus
    # f32 (T,2T) logit/exp temporaries (~48*T^2 bytes) must leave headroom.
    while tile > 8 and 16 * tile * Dp + 48 * tile * tile > (vmem_limit * 3) // 4:
        tile = max(8, _round_up(tile // 2, 8))
    return tile, vmem_limit


def _nt_xent_lse_kernel(qi_ref, qj_ref, k_ref, out_ref, m_i, l_i, m_j, l_j,
                        *, batch):
    """One (row_tile, col_tile) step of the online-logsumexp reduction.

    qi_ref / qj_ref : (T, Dp)  bf16 unit rows, pre-scaled by 1/t (queries)
    k_ref           : (2T, Dp) bf16 unit rows: [proj_i col tile ; proj_j col tile]
    out_ref         : (T, 1)   f32 per-row  lse_i + lse_j  (pad rows zeroed)
    m_*, l_*        : (T, 1)   f32 running max / running sum scratch
    """
    r = pl.program_id(0)
    c = pl.program_id(1)
    tq = qi_ref.shape[0]
    tc2 = k_ref.shape[0]
    tcol = tc2 // 2

    @pl.when(c == 0)
    def _init():
        m_i[...] = jnp.full(m_i.shape, -jnp.inf, jnp.float32)
        l_i[...] = jnp.zeros(l_i.shape, jnp.float32)
        m_j[...] = jnp.full(m_j.shape, -jnp.inf, jnp.float32)
        l_j[...] = jnp.zeros(l_j.shape, jnp.float32)

    # Two fused (T, 2T) MXU matmuls (bf16 operands, f32 accumulation); the
    # first T columns are similarities vs. the proj_i half, the last T vs. the
    # proj_j half.  1/t is already folded into the query operand (done once in
    # f32 in the wrapper), so no per-step scaling is needed.
    dn = (((1,), (1,)), ((), ()))                       # contract last dims
    k = k_ref[...]
    s_i = lax.dot_general(qi_ref[...], k, dn, preferred_element_type=jnp.float32)
    s_j = lax.dot_general(qj_ref[...], k, dn, preferred_element_type=jnp.float32)

    row_g = r * tq + lax.broadcasted_iota(jnp.int32, (tq, 1), 0)     # (T, 1)
    col2 = lax.broadcasted_iota(jnp.int32, (1, tc2), 1)              # (1, 2T)
    is_j_half = col2 >= tcol
    col_g = c * tcol + jnp.where(is_j_half, col2 - tcol, col2)       # (1, 2T)

    # Pad columns get a -1e30 bias; the true main diagonal (self-similarity)
    # is masked in the proj_i half for s_i rows and the proj_j half for s_j.
    # TODO(synk): gate the diagonal mask on r == c (only same-index tiles hit
    #             the diagonal) to shave ~2*T*2T VPU ops per off-diag step.
    pad_bias = jnp.where(col_g < batch, 0.0, _NEG_BIG)               # (1, 2T)
    diag = row_g == col_g                                            # (T, 2T)
    s_i = jnp.where(jnp.logical_and(diag, jnp.logical_not(is_j_half)),
                    _NEG_BIG, s_i) + pad_bias
    s_j = jnp.where(jnp.logical_and(diag, is_j_half), _NEG_BIG, s_j) + pad_bias

    def online_update(m_ref, l_ref, s):
        m_prev = m_ref[...]
        m_new = jnp.maximum(m_prev, jnp.max(s, axis=1, keepdims=True))
        l_ref[...] = (jnp.exp(m_prev - m_new) * l_ref[...]
                      + jnp.sum(jnp.exp(s - m_new), axis=1, keepdims=True))
        m_ref[...] = m_new

    online_update(m_i, l_i, s_i)          # rows of the proj_i half
    online_update(m_j, l_j, s_j)          # rows of the proj_j half

    @pl.when(c == pl.num_programs(1) - 1)
    def _finalize():
        lse_i = m_i[...] + jnp.log(l_i[...])
        lse_j = m_j[...] + jnp.log(l_j[...])
        rvalid = (row_g < batch).astype(jnp.float32)
        # TODO(synk): lane-dense / per-tile-scalar output layout (minor win);
        #             (tile,1) blocks kept for megacore-safe per-row-tile writeback.
        out_ref[...] = (lse_i + lse_j) * rvalid


@functools.partial(jax.jit, static_argnames=("t", "normalize", "block_rows"))
def contrastive_loss(proj_i, proj_j, *, t=0.5, normalize=True, block_rows=None):
    """Pallas TPU implementation of ContrastiveLoss.forward."""
    del normalize  # CosineSimilarity re-normalizes; the result is identical.
    B, D = proj_i.shape
    assert proj_j.shape == (B, D)
    inv_t = 1.0 / float(t)

    Dp = _round_up(D, 128)                       # lane-dense feature dim
    tile, vmem_limit = _pick_tile_and_limit(B, Dp, block_rows)
    Bp = _round_up(B, tile)
    n_tiles = Bp // tile

    # ---- Hoisted preprocessing: one fused O(B*D) f32 XLA pass ------------
    def unit_rows(x):
        x = x.astype(jnp.float32)
        ss = jnp.sum(x * x, axis=1, keepdims=True)
        return x * lax.rsqrt(jnp.maximum(ss, _EPS_SQ))

    ui = unit_rows(proj_i)                       # (B, D) f32 unit rows
    uj = unit_rows(proj_j)
    # Positive logits stay in full f32 (never touch the bf16 MXU path).
    pos_sum = jnp.sum(ui * uj)                   # sum_n <ui_n, uj_n>

    def pad_cast(x, scale=1.0):
        return jnp.pad(x * scale, ((0, Bp - B), (0, Dp - D))).astype(jnp.bfloat16)

    # Query copies carry the 1/t scaling (folded once, in f32, pre-cast);
    # key copies stay unscaled.
    q_i = pad_cast(ui, inv_t)                    # (Bp, Dp) bf16
    q_j = pad_cast(uj, inv_t)
    k_i = pad_cast(ui)
    k_j = pad_cast(uj)
    # Interleaved keys: column tile c supplies rows [i-tile c ; j-tile c].
    keys = jnp.concatenate(
        [k_i.reshape(n_tiles, tile, Dp), k_j.reshape(n_tiles, tile, Dp)],
        axis=1).reshape(2 * Bp, Dp)              # (2*Bp, Dp) bf16

    kernel = functools.partial(_nt_xent_lse_kernel, batch=B)
    per_row_lse = pl.pallas_call(
        kernel,
        out_shape=jax.ShapeDtypeStruct((Bp, 1), jnp.float32),
        grid=(n_tiles, n_tiles),
        in_specs=[
            pl.BlockSpec((tile, Dp), lambda r, c: (r, 0)),       # queries, i half
            pl.BlockSpec((tile, Dp), lambda r, c: (r, 0)),       # queries, j half
            pl.BlockSpec((2 * tile, Dp), lambda r, c: (c, 0)),   # interleaved keys
        ],
        out_specs=pl.BlockSpec((tile, 1), lambda r, c: (r, 0)),
        scratch_shapes=[pltpu.VMEM((tile, 1), jnp.float32) for _ in range(4)],
        compiler_params=pltpu.CompilerParams(
            dimension_semantics=("parallel", "arbitrary"),
            vmem_limit_bytes=vmem_limit),
    )(q_i, q_j, keys)

    # per_row_lse[n] = lse(2B-row n) + lse(2B-row n+B); pad rows are zero.
    return (jnp.sum(per_row_lse) - 2.0 * inv_t * pos_sum) / (2 * B)


def _reference_loss(proj_i, proj_j, t):
    # Pure-JAX f32 reference mirroring the PyTorch forward.
    P = jnp.concatenate([proj_i, proj_j], axis=0).astype(jnp.float32)
    N = P.shape[0]
    B = N // 2
    Pn = P / jnp.maximum(jnp.linalg.norm(P, axis=1, keepdims=True), 1e-8)
    S = Pn @ Pn.T
    logits = S / t
    idx = jnp.arange(N)
    pos = logits[idx, (idx + B) % N]
    masked = jnp.where(idx[:, None] == idx[None, :], -jnp.inf, logits)
    lse = jax.scipy.special.logsumexp(masked, axis=1)
    return jnp.sum(lse - pos) / N


if __name__ == "__main__":
    temperature = 0.5
    key = jax.random.PRNGKey(0)
    k1, k2, k3, k4 = jax.random.split(key, 4)

    # Case 1: single-tile path (batch=8, hidden=32).
    pi1 = jax.random.normal(k1, (8, 32), dtype=jnp.float32)
    pj1 = jax.random.normal(k2, (8, 32), dtype=jnp.float32)
    loss1 = jax.block_until_ready(contrastive_loss(pi1, pj1, t=temperature))
    ref1 = jax.block_until_ready(_reference_loss(pi1, pj1, temperature))
    np.testing.assert_allclose(np.asarray(loss1), np.asarray(ref1),
                               rtol=2e-2, atol=2e-2)

    # Case 2: forced small tile (batch=20, tile=8 -> 3x3 grid, 4 pad rows),
    # exercising the online logsumexp across many column tiles.
    pi2 = jax.random.normal(k3, (20, 32), dtype=jnp.float32)
    pj2 = jax.random.normal(k4, (20, 32), dtype=jnp.float32)
    loss2 = jax.block_until_ready(
        contrastive_loss(pi2, pj2, t=temperature, block_rows=8))
    ref2 = jax.block_until_ready(_reference_loss(pi2, pj2, temperature))
    np.testing.assert_allclose(np.asarray(loss2), np.asarray(ref2),
                               rtol=2e-2, atol=2e-2)

    # Case 3: default generation-aware tile selection (>=2 row tiles -> 2x2 grid).
    loss3 = jax.block_until_ready(contrastive_loss(pi2, pj2, t=temperature))
    np.testing.assert_allclose(np.asarray(loss3), np.asarray(ref2),
                               rtol=2e-2, atol=2e-2)

    print("KERNEL_OK")
</pallas_src>

<mosaic_0001>
module attributes {stable_mosaic.version = 11 : i64} {
  func.func @_nt_xent_lse_kernel(%arg0: i32, %arg1: i32, %arg2: memref<8x128xbf16, #tpu.memory_space<vmem>>, %arg3: memref<8x128xbf16, #tpu.memory_space<vmem>>, %arg4: memref<16x128xbf16, #tpu.memory_space<vmem>>, %arg5: memref<8x1xf32, #tpu.memory_space<vmem>>, %arg6: memref<8x1xf32, #tpu.memory_space<vmem>>, %arg7: memref<8x1xf32, #tpu.memory_space<vmem>>, %arg8: memref<8x1xf32, #tpu.memory_space<vmem>>, %arg9: memref<8x1xf32, #tpu.memory_space<vmem>>) attributes {dimension_semantics = [#tpu.dimension_semantics<parallel>, #tpu.dimension_semantics<arbitrary>], iteration_bounds = array<i64: 1, 1>, scalar_prefetch = 0 : i64, scratch_operands = 4 : i64, tpu.core_type = #tpu.core_type<tc>, window_params = [{transform_indices = @transform_0, window_bounds = array<i64: 8, 128>}, {transform_indices = @transform_1, window_bounds = array<i64: 8, 128>}, {transform_indices = @transform_2, window_bounds = array<i64: 16, 128>}, {transform_indices = @transform_3, window_bounds = array<i64: 8, 1>}]} {
    %c0_i32 = arith.constant 0 : i32
    %0 = arith.cmpi eq, %arg1, %c0_i32 : i32
    %1 = arith.extui %0 : i1 to i32
    %c0_i32_0 = arith.constant 0 : i32
    %2 = arith.cmpi ne, %1, %c0_i32_0 : i32
    scf.if %2 {
      %cst_38 = arith.constant 0xFF800000 : f32
      %77 = vector.broadcast %cst_38 : f32 to vector<8x1xf32>
      %c0_39 = arith.constant 0 : index
      %c0_40 = arith.constant 0 : index
      %78 = vector.load %arg6[%c0_39, %c0_40] : memref<8x1xf32, #tpu.memory_space<vmem>>, vector<8x1xf32>
      tpu.vector_store %arg6[%c0_39, %c0_40], %77 {strides = array<i32>} : memref<8x1xf32, #tpu.memory_space<vmem>>, vector<8x1xf32>,
      %cst_41 = arith.constant 0.000000e+00 : f32
      %79 = vector.broadcast %cst_41 : f32 to vector<8x1xf32>
      %c0_42 = arith.constant 0 : index
      %c0_43 = arith.constant 0 : index
      %80 = vector.load %arg7[%c0_42, %c0_43] : memref<8x1xf32, #tpu.memory_space<vmem>>, vector<8x1xf32>
      tpu.vector_store %arg7[%c0_42, %c0_43], %79 {strides = array<i32>} : memref<8x1xf32, #tpu.memory_space<vmem>>, vector<8x1xf32>,
      %cst_44 = arith.constant 0xFF800000 : f32
      %81 = vector.broadcast %cst_44 : f32 to vector<8x1xf32>
      %c0_45 = arith.constant 0 : index
      %c0_46 = arith.constant 0 : index
      %82 = vector.load %arg8[%c0_45, %c0_46] : memref<8x1xf32, #tpu.memory_space<vmem>>, vector<8x1xf32>
      tpu.vector_store %arg8[%c0_45, %c0_46], %81 {strides = array<i32>} : memref<8x1xf32, #tpu.memory_space<vmem>>, vector<8x1xf32>,
      %cst_47 = arith.constant 0.000000e+00 : f32
      %83 = vector.broadcast %cst_47 : f32 to vector<8x1xf32>
      %c0_48 = arith.constant 0 : index
      %c0_49 = arith.constant 0 : index
      %84 = vector.load %arg9[%c0_48, %c0_49] : memref<8x1xf32, #tpu.memory_space<vmem>>, vector<8x1xf32>
      tpu.vector_store %arg9[%c0_48, %c0_49], %83 {strides = array<i32>} : memref<8x1xf32, #tpu.memory_space<vmem>>, vector<8x1xf32>,
    } else {
    }
    %c0 = arith.constant 0 : index
    %c0_1 = arith.constant 0 : index
    %3 = vector.load %arg4[%c0, %c0_1] : memref<16x128xbf16, #tpu.memory_space<vmem>>, vector<16x128xbf16>
    %c0_2 = arith.constant 0 : index
    %c0_3 = arith.constant 0 : index
    %4 = vector.load %arg2[%c0_2, %c0_3] : memref<8x128xbf16, #tpu.memory_space<vmem>>, vector<8x128xbf16>
    %cst = arith.constant dense<0.000000e+00> : vector<8x16xf32>
    %5 = tpu.matmul %4, %3, %cst {dimension_numbers = #tpu.dot_dimension_numbers<[1], [1], [0], [0], [0, 0, 1, 0], [], []>} : vector<8x128xbf16>, vector<16x128xbf16>, vector<8x16xf32> -> vector<8x16xf32>
    %c0_4 = arith.constant 0 : index
    %c0_5 = arith.constant 0 : index
    %6 = vector.load %arg3[%c0_4, %c0_5] : memref<8x128xbf16, #tpu.memory_space<vmem>>, vector<8x128xbf16>
    %cst_6 = arith.constant dense<0.000000e+00> : vector<8x16xf32>
    %7 = tpu.matmul %6, %3, %cst_6 {dimension_numbers = #tpu.dot_dimension_numbers<[1], [1], [0], [0], [0, 0, 1, 0], [], []>} : vector<8x128xbf16>, vector<16x128xbf16>, vector<8x16xf32> -> vector<8x16xf32>
    %c8_i32 = arith.constant 8 : i32
    %8 = arith.muli %arg0, %c8_i32 : i32
    %9 = tpu.iota {dimensions = array<i32: 0>} : vector<8x1xi32>
    %10 = vector.broadcast %8 : i32 to vector<8x1xi32>
    %11 = arith.addi %10, %9 : vector<8x1xi32>
    %12 = tpu.iota {dimensions = array<i32: 1>} : vector<1x16xi32>
    %c8_i32_7 = arith.constant 8 : i32
    %13 = vector.broadcast %c8_i32_7 : i32 to vector<1x16xi32>
    %14 = arith.cmpi sge, %12, %13 : vector<1x16xi32>
    %c8_i32_8 = arith.constant 8 : i32
    %15 = arith.muli %arg1, %c8_i32_8 : i32
    %c8_i32_9 = arith.constant 8 : i32
    %16 = vector.broadcast %c8_i32_9 : i32 to vector<1x16xi32>
    %17 = arith.subi %12, %16 : vector<1x16xi32>
    %18 = arith.select %14, %17, %12 : vector<1x16xi1>, vector<1x16xi32>
    %19 = vector.broadcast %15 : i32 to vector<1x16xi32>
    %20 = arith.addi %19, %18 : vector<1x16xi32>
    %c8_i32_10 = arith.constant 8 : i32
    %21 = vector.broadcast %c8_i32_10 : i32 to vector<1x16xi32>
    %22 = arith.cmpi slt, %20, %21 : vector<1x16xi32>
    %cst_11 = arith.constant 0.000000e+00 : f32
    %cst_12 = arith.constant -1.000000e+30 : f32
    %23 = vector.broadcast %cst_11 : f32 to vector<1x16xf32>
    %24 = vector.broadcast %cst_12 : f32 to vector<1x16xf32>
    %25 = arith.select %22, %23, %24 : vector<1x16xi1>, vector<1x16xf32>
    %26 = vector.broadcast %11 : vector<8x1xi32> to vector<8x16xi32>
    %27 = vector.broadcast %20 : vector<1x16xi32> to vector<8x16xi32>
    %28 = arith.cmpi eq, %26, %27 : vector<8x16xi32>
    %cst_13 = arith.constant dense<true> : vector<1x16xi1>
    %29 = arith.xori %14, %cst_13 : vector<1x16xi1>
    %30 = vector.broadcast %29 : vector<1x16xi1> to vector<8x16xi1>
    %31 = arith.andi %28, %30 : vector<8x16xi1>
    %cst_14 = arith.constant -1.000000e+30 : f32
    %32 = vector.broadcast %cst_14 : f32 to vector<8x16xf32>
    %33 = arith.select %31, %32, %5 : vector<8x16xi1>, vector<8x16xf32>
    %34 = vector.broadcast %25 : vector<1x16xf32> to vector<8x16xf32>
    %35 = arith.addf %33, %34 : vector<8x16xf32>
    %36 = vector.broadcast %14 : vector<1x16xi1> to vector<8x16xi1>
    %37 = arith.andi %28, %36 : vector<8x16xi1>
    %cst_15 = arith.constant -1.000000e+30 : f32
    %38 = vector.broadcast %cst_15 : f32 to vector<8x16xf32>
    %39 = arith.select %37, %38, %7 : vector<8x16xi1>, vector<8x16xf32>
    %40 = vector.broadcast %25 : vector<1x16xf32> to vector<8x16xf32>
    %41 = arith.addf %39, %40 : vector<8x16xf32>
    %c0_16 = arith.constant 0 : index
    %c0_17 = arith.constant 0 : index
    %42 = vector.load %arg6[%c0_16, %c0_17] : memref<8x1xf32, #tpu.memory_space<vmem>>, vector<8x1xf32>
    %cst_18 = arith.constant dense<0xFF800000> : vector<8xf32>
    %43 = vector.multi_reduction <maximumf>, %35, %cst_18 [1] : vector<8x16xf32> to vector<8xf32>
    %44 = vector.shape_cast %43 : vector<8xf32> to vector<8x1xf32>
    %45 = arith.maximumf %42, %44 : vector<8x1xf32>
    %46 = arith.subf %42, %45 : vector<8x1xf32>
    %47 = math.exp %46 : vector<8x1xf32>
    %c0_19 = arith.constant 0 : index
    %c0_20 = arith.constant 0 : index
    %48 = vector.load %arg7[%c0_19, %c0_20] : memref<8x1xf32, #tpu.memory_space<vmem>>, vector<8x1xf32>
    %49 = arith.mulf %47, %48 : vector<8x1xf32>
    %50 = vector.broadcast %45 : vector<8x1xf32> to vector<8x16xf32>
    %51 = arith.subf %35, %50 : vector<8x16xf32>
    %52 = math.exp %51 : vector<8x16xf32>
    %cst_21 = arith.constant dense<0.000000e+00> : vector<8xf32>
    %53 = vector.multi_reduction <add>, %52, %cst_21 [1] : vector<8x16xf32> to vector<8xf32>
    %54 = vector.shape_cast %53 : vector<8xf32> to vector<8x1xf32>
    %55 = arith.addf %49, %54 : vector<8x1xf32>
    %c0_22 = arith.constant 0 : index
    %c0_23 = arith.constant 0 : index
    %56 = vector.load %arg7[%c0_22, %c0_23] : memref<8x1xf32, #tpu.memory_space<vmem>>, vector<8x1xf32>
    tpu.vector_store %arg7[%c0_22, %c0_23], %55 {strides = array<i32>} : memref<8x1xf32, #tpu.memory_space<vmem>>, vector<8x1xf32>,
    %c0_24 = arith.constant 0 : index
    %c0_25 = arith.constant 0 : index
    %57 = vector.load %arg6[%c0_24, %c0_25] : memref<8x1xf32, #tpu.memory_space<vmem>>, vector<8x1xf32>
    tpu.vector_store %arg6[%c0_24, %c0_25], %45 {strides = array<i32>} : memref<8x1xf32, #tpu.memory_space<vmem>>, vector<8x1xf32>,
    %c0_26 = arith.constant 0 : index
    %c0_27 = arith.constant 0 : index
    %58 = vector.load %arg8[%c0_26, %c0_27] : memref<8x1xf32, #tpu.memory_space<vmem>>, vector<8x1xf32>
    %cst_28 = arith.constant dense<0xFF800000> : vector<8xf32>
    %59 = vector.multi_reduction <maximumf>, %41, %cst_28 [1] : vector<8x16xf32> to vector<8xf32>
    %60 = vector.shape_cast %59 : vector<8xf32> to vector<8x1xf32>
    %61 = arith.maximumf %58, %60 : vector<8x1xf32>
    %62 = arith.subf %58, %61 : vector<8x1xf32>
    %63 = math.exp %62 : vector<8x1xf32>
    %c0_29 = arith.constant 0 : index
    %c0_30 = arith.constant 0 : index
    %64 = vector.load %arg9[%c0_29, %c0_30] : memref<8x1xf32, #tpu.memory_space<vmem>>, vector<8x1xf32>
    %65 = arith.mulf %63, %64 : vector<8x1xf32>
    %66 = vector.broadcast %61 : vector<8x1xf32> to vector<8x16xf32>
    %67 = arith.subf %41, %66 : vector<8x16xf32>
    %68 = math.exp %67 : vector<8x16xf32>
    %cst_31 = arith.constant dense<0.000000e+00> : vector<8xf32>
    %69 = vector.multi_reduction <add>, %68, %cst_31 [1] : vector<8x16xf32> to vector<8xf32>
    %70 = vector.shape_cast %69 : vector<8xf32> to vector<8x1xf32>
    %71 = arith.addf %65, %70 : vector<8x1xf32>
    %c0_32 = arith.constant 0 : index
    %c0_33 = arith.constant 0 : index
    %72 = vector.load %arg9[%c0_32, %c0_33] : memref<8x1xf32, #tpu.memory_space<vmem>>, vector<8x1xf32>
    tpu.vector_store %arg9[%c0_32, %c0_33], %71 {strides = array<i32>} : memref<8x1xf32, #tpu.memory_space<vmem>>, vector<8x1xf32>,
    %c0_34 = arith.constant 0 : index
    %c0_35 = arith.constant 0 : index
    %73 = vector.load %arg8[%c0_34, %c0_35] : memref<8x1xf32, #tpu.memory_space<vmem>>, vector<8x1xf32>
    tpu.vector_store %arg8[%c0_34, %c0_35], %61 {strides = array<i32>} : memref<8x1xf32, #tpu.memory_space<vmem>>, vector<8x1xf32>,
    %c0_i32_36 = arith.constant 0 : i32
    %74 = arith.cmpi eq, %arg1, %c0_i32_36 : i32
    %75 = arith.extui %74 : i1 to i32
    %c0_i32_37 = arith.constant 0 : i32
    %76 = arith.cmpi ne, %75, %c0_i32_37 : i32
    scf.if %76 {
      %c0_38 = arith.constant 0 : index
      %c0_39 = arith.constant 0 : index
      %77 = vector.load %arg6[%c0_38, %c0_39] : memref<8x1xf32, #tpu.memory_space<vmem>>, vector<8x1xf32>
      %c0_40 = arith.constant 0 : index
      %c0_41 = arith.constant 0 : index
      %78 = vector.load %arg7[%c0_40, %c0_41] : memref<8x1xf32, #tpu.memory_space<vmem>>, vector<8x1xf32>
      %79 = math.log %78 : vector<8x1xf32>
      %80 = arith.addf %77, %79 : vector<8x1xf32>
      %c0_42 = arith.constant 0 : index
      %c0_43 = arith.constant 0 : index
      %81 = vector.load %arg8[%c0_42, %c0_43] : memref<8x1xf32, #tpu.memory_space<vmem>>, vector<8x1xf32>
      %c0_44 = arith.constant 0 : index
      %c0_45 = arith.constant 0 : index
      %82 = vector.load %arg9[%c0_44, %c0_45] : memref<8x1xf32, #tpu.memory_space<vmem>>, vector<8x1xf32>
      %83 = math.log %82 : vector<8x1xf32>
      %84 = arith.addf %81, %83 : vector<8x1xf32>
      %c8_i32_46 = arith.constant 8 : i32
      %85 = vector.broadcast %c8_i32_46 : i32 to vector<8x1xi32>
      %86 = arith.cmpi slt, %11, %85 : vector<8x1xi32>
      %87 = arith.extui %86 : vector<8x1xi1> to vector<8x1xi32>
      %88 = arith.sitofp %87 : vector<8x1xi32> to vector<8x1xf32>
      %89 = arith.addf %80, %84 : vector<8x1xf32>
      %90 = arith.mulf %89, %88 : vector<8x1xf32>
      %c0_47 = arith.constant 0 : index
      %c0_48 = arith.constant 0 : index
      %91 = vector.load %arg5[%c0_47, %c0_48] : memref<8x1xf32, #tpu.memory_space<vmem>>, vector<8x1xf32>
      tpu.vector_store %arg5[%c0_47, %c0_48], %90 {strides = array<i32>} : memref<8x1xf32, #tpu.memory_space<vmem>>, vector<8x1xf32>,
    } else {
    }
    return
  }
  func.func @transform_0(%arg0: i32, %arg1: i32) -> (i32, i32) {
    %c0_i32 = arith.constant 0 : i32
    %c0_i32_0 = arith.constant 0 : i32
    return %arg0, %c0_i32 : i32, i32
  }
  func.func @transform_1(%arg0: i32, %arg1: i32) -> (i32, i32) {
    %c0_i32 = arith.constant 0 : i32
    %c0_i32_0 = arith.constant 0 : i32
    return %arg0, %c0_i32 : i32, i32
  }
  func.func @transform_2(%arg0: i32, %arg1: i32) -> (i32, i32) {
    %c0_i32 = arith.constant 0 : i32
    %c0_i32_0 = arith.constant 0 : i32
    return %arg1, %c0_i32 : i32, i32
  }
  func.func @transform_3(%arg0: i32, %arg1: i32) -> (i32, i32) {
    %c0_i32 = arith.constant 0 : i32
    %c0_i32_0 = arith.constant 0 : i32
    return %arg0, %c0_i32 : i32, i32
  }
}

</mosaic_0001>

<bundles_post_ra>
// kernel: contrastive_loss.1
= control target key start
LH: loop header
LB: loop body
LE: loop exit
PB: predicated region body
PF: predicated region fallthrough
CT: control target
= control target key end

     0   :  { %v61_v3 = vlaneseq  ;;  %vm19_vm0 = vcmask 7168   ;;  %v185_v4 = vmov -inf   ;;  %vm186_vm3 = vmmov 1   ;;  %s235_s2 = inlined_call_operand.vmem [shape: bf16[16,128], index: 2, kind: input, shape index: {}]   ;;  %s236_s0 = inlined_call_operand.vmem [shape: bf16[8,128], index: 0, kind: input, shape index: {}]   ;;  %s237_s1 = inlined_call_operand.vmem [shape: bf16[8,128], index: 1, kind: input, shape index: {}]   ;;  %s238_s3 = inlined_call_operand.vmem [shape: f32[8,1], index: 3, kind: output, shape index: {}]  }
   0x1   :  { %v165_v0 = vld [vmem:[%s235_s2] sm:$0xff]  ;;  %20 = vst.msk [vmem:[#allocation2] sm:$0xff] %vm19_vm0, %v185_v4  ;;  %v187_v9 = vmov -1e+30   ;;  %vm88_vm8 = vcmask 130048   ;;  %v188_v21 = vmov 0  }
   0x2   :  { %40 = vmatpush.bf16.xpose.msra.mxu0 %v165_v0  ;;  %54 = vmatpush.bf16.xpose.msra.mxu1 %v165_v0  ;;  %v26_v1 = vld [vmem:[%s236_s0] sm:$0xf]  ;;  %22 = vst.msk [vmem:[#allocation4] sm:$0xff] %vm19_vm0, %v185_v4  ;;  %v66_v5 = vand.u32 127, %v61_v3  ;;  %v62_v7 = vshrl.u32 %v61_v3, 7  ;;  %v189_v22 = vmov 0.0  }
   0x3   :  { %v46_v2 = vld [vmem:[%s237_s1] sm:$0xf]  ;;  %171 = vset.pattern.permute.xlu1 %v188_v21  ;;  %172 = vset.pattern.permute.xlu0 %v188_v21  ;;  %21 = vst.msk [vmem:[#allocation3] sm:$0xff] %vm19_vm0, %v189_v22 }
   0x4   :  { %v164_v6 = vadd.s32 4294967288, %v66_v5  ;;  %vm67_vm1 = vcmp.ge.s32.totalorder %v66_v5, 8  ;;  %23 = vst.msk [vmem:[#allocation5] sm:$0xff] %vm19_vm0, %v189_v22 }
   0x5   :  { %vm76_vm4 = vmxor %vm67_vm1, %vm186_vm3 }
   0x6   :  { %v70_v8 = vsel %vm67_vm1, %v164_v6, %v66_v5 }
   0x7   :  { %vm75_vm2 = vcmp.eq.s32.totalorder %v62_v7, %v70_v8  ;;  %vm73_vm5 = vcmp.lt.s32.totalorder %v70_v8, 8 }
   0x8   :  { %vm79_vm6 = vmand %vm75_vm2, %vm76_vm4  ;;  %v74_v10 = vsel %vm73_vm5, 0.0, %v187_v9  ;;  %v87_v23 = vld [vmem:[#allocation2] sm:$0xff] }
   0x9   :  { %41 = vmatmul.bf16.vlgmr.msra.gmra.mxu0 %v26_v1  ;;  %55 = vmatmul.bf16.vlgmr.msra.gmra.mxu1 %v46_v2  ;;  %vm84_vm7 = vmand %vm75_vm2, %vm67_vm1  ;;  %v113_v27 = vld [vmem:[#allocation4] sm:$0xff] }
   0xa   :  { %v96_v44 = vld [vmem:[#allocation3] sm:$0xff] }
   0xb   :  { %v121_v49 = vld [vmem:[#allocation5] sm:$0xff] }
  0x86   :  { %v42_v11 = vpop.f32.mrf.mxu0  ;;  %v56_v12 = vpop.f32.mrf.mxu1 }
  0x87   :  { %v80_v13 = vsel %vm79_vm6, -1e+30, %v42_v11  ;;  %v85_v15 = vsel %vm84_vm7, -1e+30, %v56_v12 }
  0x88   :  { %v81_v14 = vadd.f32 %v80_v13, %v74_v10  ;;  %v86_v17 = vadd.f32 %v85_v15, %v74_v10 }
  0x8a   :  { %v89_v16 = vsel %vm88_vm8, %v81_v14, -inf  ;;  %v114_v20 = vsel %vm88_vm8, %v86_v17, -inf }
  0x8b   :  { %90 = vmax.xlane.f32.xlu0 %v89_v16 }
  0x8e   :  { %v44_v18 = vpop.f32.mrf.mxu0  ;;  %v58_v19 = vpop.f32.mrf.mxu1 }
  0x93   :  { %115 = vmax.xlane.f32.xlu0 %v114_v20 }
  0xfe   :  { %v91_v24 = vpop.xlane.xlu0 %90 }
  0xff   :  { %v92_v25 = vmax.f32 %v87_v23, %v91_v24 }
 0x101   :  { %v93_v26 = vsub.f32 %v87_v23, %v92_v25  ;;  %112 = vst.msk [vmem:[#allocation2] sm:$0xff] %vm19_vm0, %v92_v25  ;;  %100 = vperm.xlu1 %171, %v92_v25  }
 0x103   :  { %v94_v41 = vmul.f32 1.442695, %v93_v26 }
 0x106   :  { %v116_v28 = vpop.xlane.xlu0 %115 }
 0x107   :  { %v117_v29 = vmax.f32 %v113_v27, %v116_v28 }
 0x108   :  { %v140_v59 = vld [vmem:[#allocation2] sm:$0xff] }
 0x109   :  { %v118_v30 = vsub.f32 %v113_v27, %v117_v29  ;;  %136 = vst.msk [vmem:[#allocation4] sm:$0xff] %vm19_vm0, %v117_v29  ;;  %125 = vperm.xlu1 %171, %v117_v29  }
 0x10b   :  { %v119_v42 = vmul.f32 1.442695, %v118_v30 }
 0x110   :  { %v145_v60 = vld [vmem:[#allocation4] sm:$0xff] }
 0x173   :  { %v101_v31 = vpop.permute.xlu1 %100 }
 0x174   :  { %v103_v32 = vsub.f32 %v81_v14, %v101_v31 }
 0x176   :  { %v104_v33 = vmul.f32 1.442695, %v103_v32 }
 0x178   :  { %173 = vpow2.f32 %v104_v33 }
 0x17b   :  { %v126_v34 = vpop.permute.xlu1 %125 }
 0x17c   :  { %v128_v35 = vsub.f32 %v86_v17, %v126_v34 }
 0x17e   :  { %v174_v36 = vpop.eup %173  ;;  %v129_v37 = vmul.f32 1.442695, %v128_v35 }
 0x17f   :  { %v106_v38 = vsel %vm88_vm8, %v174_v36, 0.0 }
 0x180   :  { %175 = vpow2.f32 %v129_v37  ;;  %107 = vadd.xlane.f32.xlu2 %v106_v38 }
 0x181   :  { %177 = vpow2.f32 %v94_v41 }
 0x182   :  { %179 = vpow2.f32 %v119_v42 }
 0x186   :  { %v176_v39 = vpop.eup %175 }
 0x187   :  { %v131_v40 = vsel %vm88_vm8, %v176_v39, 0.0  ;;  %v178_v43 = vpop.eup %177 }
 0x188   :  { %132 = vadd.xlane.f32.xlu2 %v131_v40  ;;  %v97_v45 = vmul.f32 %v178_v43, %v96_v44  ;;  %v180_v48 = vpop.eup %179 }
 0x189   :  { %v122_v50 = vmul.f32 %v180_v48, %v121_v49 }
 0x1f3   :  { %v108_v46 = vpop.xlane.xlu2 %107 }
 0x1f4   :  { %v109_v47 = vadd.f32 %v108_v46, %v97_v45 }
 0x1f6   :  { %111 = vst.msk [vmem:[#allocation3] sm:$0xff] %vm19_vm0, %v109_v47 }
 0x1fb   :  { %v133_v51 = vpop.xlane.xlu2 %132 }
 0x1fc   :  { %v134_v52 = vadd.f32 %v133_v51, %v122_v50 }
 0x1fd   :  { %v141_v53 = vld [vmem:[#allocation3] sm:$0xff] }
 0x1fe   :  { %135 = vst.msk [vmem:[#allocation5] sm:$0xff] %vm19_vm0, %v134_v52  ;;  %181 = vlog2.f32 %v141_v53 }
 0x204   :  { %v182_v55 = vpop.eup %181 }
 0x205   :  { %v146_v54 = vld [vmem:[#allocation5] sm:$0xff]  ;;  %v143_v56 = vmul.f32 0.6931472, %v182_v55 }
 0x206   :  { %183 = vlog2.f32 %v146_v54 }
 0x207   :  { %v144_v61 = vadd.f32 %v143_v56, %v140_v59 }
 0x20c   :  { %v184_v57 = vpop.eup %183 }
 0x20d   :  { %v148_v58 = vmul.f32 0.6931472, %v184_v57 }
 0x20f   :  { %v149_v62 = vadd.f32 %v148_v58, %v145_v60 }
 0x211   :  { %v153_v63 = vadd.f32 %v149_v62, %v144_v61 }
 0x213   :  { %155 = vst.msk [vmem:[%s238_s3] sm:$0xff] %vm19_vm0, %v153_v63 }

</bundles_post_ra>
